<compile_context>
chip_gen: v7x
topology: tpu7x:2x2x1
jax: 0.10.0
libtpu: 0.0.40
codegen_flags: <defaults>
</compile_context>

<pallas_src>
import jax
import jax.numpy as jnp
from jax.experimental import pallas as pl
from jax.experimental.pallas import tpu as pltpu


def conv_relu_pool_kernel(col_ref, w_ref, b_ref, o_ref):
    # col_ref: (9*E, H*W)  im2col patches, spatial (H*W) on the lane axis
    # w_ref:   (F, 9*E)    packed conv weights
    # b_ref:   (F, 1)      conv bias
    # o_ref:   (F, 1)      pooled output
    y = jnp.dot(w_ref[...], col_ref[...],
                preferred_element_type=jnp.float32)        # (F, H*W)  one MXU matmul
    y = jnp.maximum(y + b_ref[...], 0.0)                   # bias + ReLU (f32, VPU)
    # AdaptiveAvgPool2d((1,1)) == mean over all H*W positions (lane reduce).
    o_ref[...] = jnp.mean(y, axis=1, keepdims=True)


@jax.jit
def my_cnn_forward(dep, emb_table, conv_w, conv_b):
    """dep: (H, W) int32 indices; returns (num_filter,) float32 (matches PyTorch)."""
    H, W = dep.shape
    E = emb_table.shape[1]
    F = conv_w.shape[0]

    # --- glue (fused by XLA under jit): embedding lookup + conv zero-padding ---
    emb = jnp.take(emb_table, dep, axis=0).astype(jnp.float32)   # (H, W, E)
    x_pad = jnp.pad(emb, ((1, 1), (1, 1), (0, 0)))               # (H+2, W+2, E)

    # im2col -> (9*E, H*W): row index = (3*ky + kx)*E + e, lane index = y*W + x.
    taps = [x_pad[ky:ky + H, kx:kx + W, :]
            for ky in range(3) for kx in range(3)]                # 9 x (H, W, E)
    col = jnp.stack(taps, axis=0)                                 # (9, H, W, E)
    col = col.transpose(0, 3, 1, 2).reshape(9 * E, H * W)         # (9E, HW)

    # Pack PyTorch conv weight (F, E, 3, 3) -> (F, 3, 3, E) -> (F, 9E) so its
    # column index matches col's row index.  Bias -> (F, 1).
    w_packed = jnp.transpose(conv_w, (0, 2, 3, 1)).reshape(F, 9 * E)
    b = conv_b.reshape(F, 1).astype(jnp.float32)

    out = pl.pallas_call(
        conv_relu_pool_kernel,
        out_shape=jax.ShapeDtypeStruct((F, 1), jnp.float32),
        in_specs=[
            pl.BlockSpec(memory_space=pltpu.MemorySpace.VMEM),
            pl.BlockSpec(memory_space=pltpu.MemorySpace.VMEM),
            pl.BlockSpec(memory_space=pltpu.MemorySpace.VMEM),
        ],
        out_specs=pl.BlockSpec(memory_space=pltpu.MemorySpace.VMEM),
    )(col, w_packed, b)
    return out[:, 0]                                              # (F,)


def reference_forward(dep, emb_table, conv_w, conv_b):
    """Pure-JAX reference mirroring the PyTorch forward exactly (NCHW conv)."""
    emb = jnp.take(emb_table, dep, axis=0)              # (H, W, E)
    x = jnp.transpose(emb, (2, 0, 1))[None]             # (1, E, H, W)
    y = jax.lax.conv_general_dilated(
        x, conv_w, window_strides=(1, 1), padding=((1, 1), (1, 1)),
        dimension_numbers=("NCHW", "OIHW", "NCHW"),
        precision=jax.lax.Precision.HIGHEST)
    y = y + conv_b[None, :, None, None]
    y = jnp.maximum(y, 0.0)
    return jnp.mean(y, axis=(2, 3))[0]                  # (F,)


if __name__ == "__main__":
    num_dep, emb_size, num_filter = 20, 8, 16
    H, W = 16, 16

    key = jax.random.PRNGKey(0)
    k1, k2, k3, k4 = jax.random.split(key, 4)

    dep = jax.random.randint(k1, (H, W), 0, num_dep, dtype=jnp.int32)
    emb_table = jax.random.normal(k2, (num_dep, emb_size), dtype=jnp.float32)
    # Deterministic synthetic conv params (shape-compatible with nn.Conv2d init).
    fan_in = emb_size * 3 * 3
    bound = 1.0 / (fan_in ** 0.5)
    conv_w = jax.random.uniform(k3, (num_filter, emb_size, 3, 3),
                                jnp.float32, -bound, bound)
    conv_b = jax.random.uniform(k4, (num_filter,), jnp.float32, -bound, bound)

    out = my_cnn_forward(dep, emb_table, conv_w, conv_b)
    jax.block_until_ready(out)

    ref = reference_forward(dep, emb_table, conv_w, conv_b)
    assert out.shape == (num_filter,), out.shape
    # Tolerance loosened slightly vs HIGHEST-precision reference: the kernel
    # uses default MXU precision (bf16 passes) with f32 accumulation.
    assert jnp.allclose(out, ref, atol=2e-3, rtol=2e-3), (out, ref)
    print("KERNEL_OK")
</pallas_src>

<mosaic_0001>
module attributes {stable_mosaic.version = 11 : i64} {
  func.func @conv_relu_pool_kernel(%arg0: memref<72x256xf32, #tpu.memory_space<vmem>>, %arg1: memref<16x72xf32, #tpu.memory_space<vmem>>, %arg2: memref<16x1xf32, #tpu.memory_space<vmem>>, %arg3: memref<16x1xf32, #tpu.memory_space<vmem>>) attributes {dimension_semantics = [], scalar_prefetch = 0 : i64, scratch_operands = 0 : i64, tpu.core_type = #tpu.core_type<tc>} {
    %c0 = arith.constant 0 : index
    %c0_0 = arith.constant 0 : index
    %0 = vector.load %arg1[%c0, %c0_0] : memref<16x72xf32, #tpu.memory_space<vmem>>, vector<16x72xf32>
    %c0_1 = arith.constant 0 : index
    %c0_2 = arith.constant 0 : index
    %1 = vector.load %arg0[%c0_1, %c0_2] : memref<72x256xf32, #tpu.memory_space<vmem>>, vector<72x256xf32>
    %cst = arith.constant dense<0.000000e+00> : vector<16x256xf32>
    %2 = tpu.matmul %0, %1, %cst {dimension_numbers = #tpu.dot_dimension_numbers<[1], [0], [0], [1], [0, 0, 1, 1], [], []>} : vector<16x72xf32>, vector<72x256xf32>, vector<16x256xf32> -> vector<16x256xf32>
    %c0_3 = arith.constant 0 : index
    %c0_4 = arith.constant 0 : index
    %3 = vector.load %arg2[%c0_3, %c0_4] : memref<16x1xf32, #tpu.memory_space<vmem>>, vector<16x1xf32>
    %4 = vector.broadcast %3 : vector<16x1xf32> to vector<16x256xf32>
    %5 = arith.addf %2, %4 : vector<16x256xf32>
    %cst_5 = arith.constant 0.000000e+00 : f32
    %6 = vector.broadcast %cst_5 : f32 to vector<16x256xf32>
    %7 = arith.maximumf %5, %6 : vector<16x256xf32>
    %cst_6 = arith.constant dense<0.000000e+00> : vector<16xf32>
    %8 = vector.multi_reduction <add>, %7, %cst_6 [1] : vector<16x256xf32> to vector<16xf32>
    %9 = vector.shape_cast %8 : vector<16xf32> to vector<16x1xf32>
    %cst_7 = arith.constant 2.560000e+02 : f32
    %10 = vector.broadcast %cst_7 : f32 to vector<16x1xf32>
    %11 = arith.divf %9, %10 : vector<16x1xf32>
    %c0_8 = arith.constant 0 : index
    %c0_9 = arith.constant 0 : index
    %12 = vector.load %arg3[%c0_8, %c0_9] : memref<16x1xf32, #tpu.memory_space<vmem>>, vector<16x1xf32>
    tpu.vector_store %arg3[%c0_8, %c0_9], %11 {strides = array<i32>} : memref<16x1xf32, #tpu.memory_space<vmem>>, vector<16x1xf32>,
    return
  }
}

</mosaic_0001>

<bundles_post_ra>
// kernel: my_cnn_forward.1
= control target key start
LH: loop header
LB: loop body
LE: loop exit
PB: predicated region body
PF: predicated region fallthrough
CT: control target
= control target key end

     0   :  { %v181_v3 = vmov 0.0   ;;  %v182_v8 = vmov 0   ;;  %vm46_vm0 = vcmask 588800   ;;  %vm143_vm1 = vcmask 7168   ;;  %s275_s0 = inlined_call_operand.vmem [shape: f32[72,256], index: 0, kind: input, shape index: {}]   ;;  %s276_s2 = inlined_call_operand.vmem [shape: f32[16,1], index: 2, kind: input, shape index: {}]   ;;  %s277_s1 = inlined_call_operand.vmem [shape: f32[16,72], index: 1, kind: input, shape index: {}]   ;;  %s278_s3 = inlined_call_operand.vmem [shape: f32[16,1], index: 3, kind: output, shape index: {}]  }
   0x1   :  { %v17_v0 = vld [vmem:[%s275_s0 + $0x8] sm:$0xff]  ;;  %v19_v1 = vld [vmem:[%s275_s0 + $0x18] sm:$0xff]  ;;  %v16_v2 = vld [vmem:[%s275_s0] sm:$0xff]  ;;  %117 = vmatprep.mubr.f32.mxu0 %v181_v3  ;;  %123 = vmatprep.mubr.f32.mxu1 %v181_v3 }
   0x2   :  { %v152_v4 = vpack.c.bf16 %v19_v1, %v17_v0  ;;  %v18_v5 = vld [vmem:[%s275_s0 + $0x10] sm:$0xff]  ;;  %v21_v6 = vld [vmem:[%s275_s0 + $0x28] sm:$0xff]  ;;  %v23_v7 = vld [vmem:[%s275_s0 + $0x38] sm:$0xff]  ;;  %180 = vset.pattern.permute.xlu0 %v182_v8 }
   0x3   :  { %v154_v9 = vpack.c.bf16 %v18_v5, %v16_v2  ;;  %v156_v10 = vpack.c.bf16 %v23_v7, %v21_v6  ;;  %v20_v11 = vld [vmem:[%s275_s0 + $0x20] sm:$0xff]  ;;  %v22_v12 = vld [vmem:[%s275_s0 + $0x30] sm:$0xff]  ;;  %v25_v13 = vld [vmem:[%s275_s0 + $0x48] sm:$0xff] }
   0x4   :  { %153 = vmatprep.subr.bf16.mxu0 %v152_v4  ;;  %168 = vmatprep.subr.bf16.mxu1 %v152_v4  ;;  %v27_v14 = vld [vmem:[%s275_s0 + $0x58] sm:$0xff]  ;;  %v158_v15 = vpack.c.bf16 %v22_v12, %v20_v11  ;;  %v24_v17 = vld [vmem:[%s275_s0 + $0x40] sm:$0xff]  ;;  %v26_v18 = vld [vmem:[%s275_s0 + $0x50] sm:$0xff] }
   0x5   :  { %155 = vmatpush1.bf16.msra.mxu0 %v154_v9  ;;  %173 = vmatpush1.bf16.msra.mxu1 %v154_v9  ;;  %v160_v16 = vpack.c.bf16 %v27_v14, %v25_v13  ;;  %v29_v19 = vld [vmem:[%s275_s0 + $0x68] sm:$0xff]  ;;  %v31_v20 = vld [vmem:[%s275_s0 + $0x78] sm:$0xff]  ;;  %v34_v21 = vld [vmem:[%s276_s2] sm:$0xff]  ;;  %v162_v22 = vpack.c.bf16 %v26_v18, %v24_v17 }
   0x6   :  { %157 = vmatprep.subr.bf16.mxu0 %v156_v10  ;;  %169 = vmatprep.subr.bf16.mxu1 %v156_v10  ;;  %v35_v23 = vld [vmem:[%s276_s2 + $0x8] sm:$0xff]  ;;  %v164_v24 = vpack.c.bf16 %v31_v20, %v29_v19  ;;  %v28_v25 = vld [vmem:[%s275_s0 + $0x60] sm:$0xff]  ;;  %v30_v26 = vld [vmem:[%s275_s0 + $0x70] sm:$0xff] }
   0x7   :  { %38 = vperm.xlu0 %180, %v34_v21   ;;  %v166_v27 = vpack.c.bf16 %v30_v26, %v28_v25  ;;  %v33_v28 = vld [vmem:[%s275_s0 + $0x88] sm:$0xff]  ;;  %v32_v29 = vld [vmem:[%s275_s0 + $0x80] sm:$0xff] }
   0x8   :  { %v14_v30 = vld [vmem:[%s277_s1] sm:$0xff]  ;;  %v15_v31 = vld [vmem:[%s277_s1 + $0x8] sm:$0xff] }
   0x9   :  { %159 = vmatpush1.bf16.msra.mxu0 %v158_v15  ;;  %174 = vmatpush1.bf16.msra.mxu1 %v158_v15 }
   0xa   :  { %161 = vmatprep.subr.bf16.mxu0 %v160_v16  ;;  %170 = vmatprep.subr.bf16.mxu1 %v160_v16 }
   0xb   :  { %43 = vperm.xlu0 %180, %v35_v23  }
   0xd   :  { %163 = vmatpush1.bf16.msra.mxu0 %v162_v22  ;;  %175 = vmatpush1.bf16.msra.mxu1 %v162_v22 }
   0xe   :  { %165 = vmatprep.subr.bf16.mxu0 %v164_v24  ;;  %171 = vmatprep.subr.bf16.mxu1 %v164_v24 }
  0x11   :  { %167 = vmatpush1.bf16.msra.mxu0 %v166_v27  ;;  %176 = vmatpush1.bf16.msra.mxu1 %v166_v27 }
  0x12   :  { %69 = vmatprep.subr.mxu0 %v33_v28  ;;  %172 = vmatprep.subr.mxu1 %v33_v28 }
  0x15   :  { %70 = vmatpush1.msra.mxu0 %v32_v29  ;;  %177 = vmatpush1.msra.mxu1 %v32_v29 }
  0x16   :  { %150 = vmatmul.mubr.msk.f32.vlgmr.msra.gmra.mrb[0].mxu0 %vm46_vm0, %v14_v30  ;;  %151 = vmatmul.mubr.msk.f32.vlgmr.msra.gmra.mrb[0].mxu1 %vm46_vm0, %v15_v31 }
  0x86   :  { %v39_v32 = vpop.permute.xlu0 %38 }
  0x8a   :  { %v44_v33 = vpop.permute.xlu0 %43 }
  0xe9   :  { %v119_v34 = vpop.f32.mrb[0].mxu0  ;;  %v125_v35 = vpop.f32.mrb[0].mxu1 }
  0xea   :  { %v120_v36 = vadd.f32 %v119_v34, %v39_v32  ;;  %v126_v37 = vadd.f32 %v125_v35, %v44_v33  ;;  %v121_v38 = vpop.f32.mrb[1].mxu0  ;;  %v127_v39 = vpop.f32.mrb[1].mxu1 }
  0xeb   :  { %v122_v40 = vadd.f32 %v121_v38, %v39_v32  ;;  %v128_v41 = vadd.f32 %v127_v39, %v44_v33 }
  0xec   :  { %v130_v42 = vmax.f32 %v120_v36, 0.0  ;;  %v132_v43 = vmax.f32 %v126_v37, 0.0 }
  0xed   :  { %v131_v44 = vmax.f32 %v122_v40, 0.0  ;;  %v133_v45 = vmax.f32 %v128_v41, 0.0 }
  0xef   :  { %v134_v46 = vadd.f32 %v131_v44, %v130_v42  ;;  %v137_v47 = vadd.f32 %v133_v45, %v132_v43 }
  0xf1   :  { %135 = vadd.xlane.f32.xlu1 %v134_v46 }
  0xf5   :  { %138 = vadd.xlane.f32.xlu1 %v137_v47 }
 0x17e   :  { %v136_v48 = vpop.xlane.xlu1 %135 }
 0x17f   :  { %v141_v49 = vmul.f32 0.00390625, %v136_v48 }
 0x181   :  { %144 = vst.msk [vmem:[%s278_s3] sm:$0xff] %vm143_vm1, %v141_v49 }
 0x182   :  { %v139_v50 = vpop.xlane.xlu1 %138 }
 0x183   :  { %v142_v51 = vmul.f32 0.00390625, %v139_v50 }
 0x185   :  { %145 = vst.msk [vmem:[%s278_s3 + $0x8] sm:$0xff] %vm143_vm1, %v142_v51 }

</bundles_post_ra>
